<compile_context>
chip_gen: v7x
topology: tpu7x:2x2x1
jax: 0.10.0
libtpu: 0.0.40
codegen_flags: <defaults>
</compile_context>

<pallas_src>
import jax
import jax.numpy as jnp
from jax.experimental import pallas as pl
from jax.experimental.pallas import tpu as pltpu


def _patch_embed_kernel(x_ref, w_ref, b_ref, o_ref):
    # (tm, K_pad) @ (K_pad, tn) on the MXU with f32 accumulation, bias add,
    # cast back on the (lane-dense) store.
    acc = jnp.dot(x_ref[...], w_ref[...], preferred_element_type=jnp.float32)
    o_ref[...] = (acc + b_ref[...]).astype(o_ref.dtype)


def _round_up(x, m):
    return int(pl.cdiv(int(x), m) * m)


def _mxu_pad(dim):
    # Lane-dense padding.  Past one 128-chunk, align to 256 so the 2x256x256 MXU
    # on v6e/v7x is not half-filled by a trailing 128-wide chunk; tiny dims stay
    # at 128 to avoid inflating them 4-8x.
    return _round_up(dim, 128) if dim <= 128 else _round_up(dim, 256)


def _vmem_params():
    """Generation-aware (vmem_limit_bytes, working-set budget)."""
    phys = 64 << 20                       # conservative fallback (v7x-sized)
    try:
        phys = int(pltpu.get_tpu_info().vmem_capacity_bytes)
    except Exception:
        pass
    limit = min(phys // 2, 64 << 20)      # ~64 MiB on v5e/v6e, ~32 MiB on v7x
    budget = (limit * 3) // 4             # headroom for compiler scratch
    return limit, budget


def patch_embed_matmul(patches, weight, bias, *, compute_dtype=None, out_dtype=None):
    """patches: (M, K), weight: (K, D), bias: (D,) -> (M, D)."""
    M, K = patches.shape
    K2, D = weight.shape
    assert K == K2, (K, K2)

    out_dt = jnp.dtype(out_dtype) if out_dtype is not None else jnp.dtype(patches.dtype)
    cdt = jnp.dtype(compute_dtype) if compute_dtype is not None else jnp.dtype(patches.dtype)
    in_bytes = cdt.itemsize
    out_bytes = out_dt.itemsize
    sub = max(8, 32 // in_bytes)          # sublane multiple: 8 (f32) / 16 (bf16)

    K_pad = _mxu_pad(K)
    D_pad = _mxu_pad(D)
    M_pad = _round_up(M, sub)             # M pads only to the sublane multiple

    vmem_limit, vmem_budget = _vmem_params()

    # Weight-resident decision: keep the whole projection matrix (plus its unused
    # second pipeline buffer) within half the working-set budget.
    # TODO(synk): pipeline_mode=pl.Buffered(1) on the resident weight/bias specs
    # would drop the unused second buffer; kept default for compile robustness.
    w_bytes = K_pad * D_pad * in_bytes
    weight_resident = 2 * (w_bytes + D_pad * 4) <= vmem_budget // 2

    tn = D_pad if weight_resident else (256 if D_pad % 256 == 0 else 128)

    # M tile: 1024 rows (f32) / 2048 rows (bf16), capped by the problem size and
    # shrunk until the double-buffered working set fits the budget.
    tm = _round_up(min(4096 // in_bytes, M_pad), sub)

    def _footprint(tm_):
        return 2 * (tm_ * K_pad * in_bytes      # streamed patch rows
                    + K_pad * tn * in_bytes     # weight tile (resident: fetched once)
                    + tn * 4                    # bias
                    + tm_ * tn * out_bytes)     # output tile

    while _footprint(tm) > vmem_budget and tm > sub:
        tm = max(sub, _round_up(tm // 2, sub))

    # v7x megacore: make sure the parallel M axis has >=2 tiles so both
    # TensorCores get work (per-step overhead is negligible on 1-TC chips).
    if pl.cdiv(M_pad, tm) < 2 and M_pad >= 2 * sub:
        tm = _round_up(pl.cdiv(M_pad, 2), sub)

    m_tiles = int(pl.cdiv(M_pad, tm))     # last M tile may be partial (masked)

    # Single convert+pad producer per operand (K/D zero-pads are required for
    # correctness; the tiny M pad is only to the sublane multiple).
    p = patches if cdt == patches.dtype else patches.astype(cdt)
    if (M_pad, K_pad) != (M, K):
        p = jnp.pad(p, ((0, M_pad - M), (0, K_pad - K)))
    w = weight if cdt == weight.dtype else weight.astype(cdt)
    if (K_pad, D_pad) != (K, D):
        w = jnp.pad(w, ((0, K_pad - K), (0, D_pad - D)))
    b2 = bias.astype(jnp.float32).reshape(1, D)
    if D_pad != D:
        b2 = jnp.pad(b2, ((0, 0), (0, D_pad - D)))

    if weight_resident:
        grid = (m_tiles,)
        in_specs = [
            pl.BlockSpec((tm, K_pad), lambda i: (i, 0)),   # streamed patch rows
            pl.BlockSpec((K_pad, tn), lambda i: (0, 0)),   # resident weight
            pl.BlockSpec((1, tn), lambda i: (0, 0)),       # resident bias
        ]
        out_specs = pl.BlockSpec((tm, tn), lambda i: (i, 0))
        dims = ("parallel",)
        w_traffic = w_bytes                                # fetched once
    else:
        grid = (m_tiles, D_pad // tn)
        in_specs = [
            pl.BlockSpec((tm, K_pad), lambda i, j: (i, 0)),
            pl.BlockSpec((K_pad, tn), lambda i, j: (0, j)),
            pl.BlockSpec((1, tn), lambda i, j: (0, j)),
        ]
        out_specs = pl.BlockSpec((tm, tn), lambda i, j: (i, j))
        dims = ("parallel", "parallel")
        w_traffic = m_tiles * w_bytes                      # re-fetched per M tile

    cost = pl.CostEstimate(
        flops=2 * M_pad * K_pad * D_pad,
        transcendentals=0,
        bytes_accessed=(M_pad * K_pad * in_bytes + w_traffic + D_pad * 4
                        + M_pad * D_pad * out_bytes),
    )

    out = pl.pallas_call(
        _patch_embed_kernel,
        out_shape=jax.ShapeDtypeStruct((M_pad, D_pad), out_dt),
        grid_spec=pltpu.PrefetchScalarGridSpec(
            num_scalar_prefetch=0,
            grid=grid,
            in_specs=in_specs,
            out_specs=out_specs,
        ),
        compiler_params=pltpu.CompilerParams(
            dimension_semantics=dims,
            vmem_limit_bytes=vmem_limit,
        ),
        cost_estimate=cost,
    )(p, w, b2)

    return out[:M, :D]


def patch_embed_forward(x, conv_w, conv_b, patch_size, *,
                        compute_dtype=jnp.bfloat16, out_dtype=None):
    """x: (B, C, H, W) NCHW.  conv_w: (D, C, P, P).  conv_b: (D,).
    Returns (B, num_patches, D), exactly PatchEmbed.forward =
    proj(x).flatten(2).transpose(1, 2).

    compute_dtype defaults to bf16 (MXU operands) on all TPU generations, with
    f32 accumulation inside the kernel; pass jnp.float32 for strict precision.
    """
    B, C, H, W = x.shape
    P = patch_size
    D = conv_w.shape[0]
    Hp, Wp = H // P, W // P
    N = Hp * Wp

    # im2col patch extraction -> (B*N, C*P*P), materialized once by XLA as a
    # single transpose pass (predictable, lane-dense DMA into the kernel).
    # TODO(synk): benchmark allow_input_fusion of this transpose into the kernel
    #   input DMA vs. this materialized im2col per generation (fused DMA has only
    #   P-element contiguous runs and can be descriptor-bound, esp. on v7x).
    # TODO(synk): expressing the patch gather directly in the BlockSpec index_map
    #   over the original NCHW x would remove the HBM intermediate entirely.
    patches = (
        x.reshape(B, C, Hp, P, Wp, P)
         .transpose(0, 2, 4, 1, 3, 5)            # (B, Hp, Wp, C, P, P)
         .reshape(B * N, C * P * P)
    )
    # Conv weight -> dense projection matrix (K, D)
    w_mat = conv_w.reshape(D, C * P * P).T

    out = patch_embed_matmul(patches, w_mat, conv_b,
                             compute_dtype=compute_dtype, out_dtype=out_dtype)
    return out.reshape(B, N, D)


def _reference_forward(x, conv_w, conv_b, patch_size):
    """Pure-JAX reference matching PyTorch Conv2d(stride=kernel)+flatten+transpose."""
    out = jax.lax.conv_general_dilated(
        x, conv_w,
        window_strides=(patch_size, patch_size),
        padding="VALID",
        dimension_numbers=("NCHW", "OIHW", "NCHW"),
    ) + conv_b[None, :, None, None]
    B, D, Hp, Wp = out.shape
    return out.reshape(B, D, Hp * Wp).transpose(0, 2, 1)


if __name__ == "__main__":
    # Small shapes consistent with the module: img_size=16, patch_size=4,
    # in_chans=4, embed_dim=32  ->  num_patches = 16, patch_dim = 64.
    B, C, IMG, P, EMB = 2, 4, 16, 4, 32

    key = jax.random.PRNGKey(0)
    kx, kw, kb = jax.random.split(key, 3)

    x = jax.random.normal(kx, (B, C, IMG, IMG), dtype=jnp.float32)
    # Deterministic parameter init (shapes from nn.Conv2d(C, EMB, P, stride=P)).
    fan_in = C * P * P
    bound = 1.0 / (fan_in ** 0.5)
    conv_w = jax.random.uniform(kw, (EMB, C, P, P), jnp.float32, -bound, bound)
    conv_b = jax.random.uniform(kb, (EMB,), jnp.float32, -bound, bound)

    fwd = jax.jit(patch_embed_forward,
                  static_argnames=("patch_size", "compute_dtype", "out_dtype"))
    ref = _reference_forward(x, conv_w, conv_b, P)
    N = (IMG // P) * (IMG // P)

    # Strict f32 check against the Conv2d reference.
    out_f32 = jax.block_until_ready(
        fwd(x, conv_w, conv_b, patch_size=P, compute_dtype=jnp.float32))
    assert out_f32.shape == (B, N, EMB), out_f32.shape
    assert jnp.allclose(out_f32, ref, atol=1e-4, rtol=1e-4), \
        float(jnp.max(jnp.abs(out_f32 - ref)))

    # Default path: bf16 MXU operands with f32 accumulation (all generations).
    out_bf16 = jax.block_until_ready(fwd(x, conv_w, conv_b, patch_size=P))
    assert out_bf16.shape == out_f32.shape
    assert jnp.allclose(out_bf16, ref, atol=5e-2, rtol=5e-2), \
        float(jnp.max(jnp.abs(out_bf16 - ref)))

    # bf16 output store (halves output HBM traffic when downstream accepts it).
    out_bf16_store = jax.block_until_ready(
        fwd(x, conv_w, conv_b, patch_size=P, out_dtype=jnp.bfloat16))
    assert out_bf16_store.dtype == jnp.bfloat16
    assert jnp.allclose(out_bf16_store.astype(jnp.float32), ref,
                        atol=5e-2, rtol=5e-2)

    print("KERNEL_OK")
</pallas_src>

<mosaic_0001>
module attributes {stable_mosaic.version = 11 : i64} {
  func.func @_patch_embed_kernel(%arg0: i32, %arg1: memref<16x128xf32, #tpu.memory_space<vmem>>, %arg2: memref<128x128xf32, #tpu.memory_space<vmem>>, %arg3: memref<1x128xf32, #tpu.memory_space<vmem>>, %arg4: memref<16x128xf32, #tpu.memory_space<vmem>>) attributes {dimension_semantics = [#tpu.dimension_semantics<parallel>], iteration_bounds = array<i64: 2>, scalar_prefetch = 0 : i64, scratch_operands = 0 : i64, tpu.core_type = #tpu.core_type<tc>, window_params = [{transform_indices = @transform_0, window_bounds = array<i64: 16, 128>}, {pipeline_mode = #tpu.pipeline_mode<synchronous>, transform_indices = @transform_1, window_bounds = array<i64: 128, 128>}, {pipeline_mode = #tpu.pipeline_mode<synchronous>, transform_indices = @transform_2, window_bounds = array<i64: 1, 128>}, {transform_indices = @transform_3, window_bounds = array<i64: 16, 128>}]} {
    %c0 = arith.constant 0 : index
    %c0_0 = arith.constant 0 : index
    %0 = vector.load %arg1[%c0, %c0_0] : memref<16x128xf32, #tpu.memory_space<vmem>>, vector<16x128xf32>
    %c0_1 = arith.constant 0 : index
    %c0_2 = arith.constant 0 : index
    %1 = vector.load %arg2[%c0_1, %c0_2] : memref<128x128xf32, #tpu.memory_space<vmem>>, vector<128x128xf32>
    %cst = arith.constant dense<0.000000e+00> : vector<16x128xf32>
    %2 = tpu.matmul %0, %1, %cst {dimension_numbers = #tpu.dot_dimension_numbers<[1], [0], [0], [1], [0, 0, 1, 1], [], []>} : vector<16x128xf32>, vector<128x128xf32>, vector<16x128xf32> -> vector<16x128xf32>
    %c0_3 = arith.constant 0 : index
    %c0_4 = arith.constant 0 : index
    %3 = vector.load %arg3[%c0_3, %c0_4] : memref<1x128xf32, #tpu.memory_space<vmem>>, vector<1x128xf32>
    %4 = vector.broadcast %3 : vector<1x128xf32> to vector<16x128xf32>
    %5 = arith.addf %2, %4 : vector<16x128xf32>
    %c0_5 = arith.constant 0 : index
    %c0_6 = arith.constant 0 : index
    %6 = vector.load %arg4[%c0_5, %c0_6] : memref<16x128xf32, #tpu.memory_space<vmem>>, vector<16x128xf32>
    tpu.vector_store %arg4[%c0_5, %c0_6], %5 {strides = array<i32>} : memref<16x128xf32, #tpu.memory_space<vmem>>, vector<16x128xf32>,
    return
  }
  func.func @transform_0(%arg0: i32) -> (i32, i32) {
    %c0_i32 = arith.constant 0 : i32
    %c0_i32_0 = arith.constant 0 : i32
    return %arg0, %c0_i32 : i32, i32
  }
  func.func @transform_1(%arg0: i32) -> (i32, i32) {
    %c0_i32 = arith.constant 0 : i32
    %c0_i32_0 = arith.constant 0 : i32
    %c0_i32_1 = arith.constant 0 : i32
    return %c0_i32, %c0_i32_0 : i32, i32
  }
  func.func @transform_2(%arg0: i32) -> (i32, i32) {
    %c0_i32 = arith.constant 0 : i32
    %c0_i32_0 = arith.constant 0 : i32
    %c0_i32_1 = arith.constant 0 : i32
    return %c0_i32, %c0_i32_0 : i32, i32
  }
  func.func @transform_3(%arg0: i32) -> (i32, i32) {
    %c0_i32 = arith.constant 0 : i32
    %c0_i32_0 = arith.constant 0 : i32
    return %arg0, %c0_i32 : i32, i32
  }
}

</mosaic_0001>

<bundles_post_ra>
// kernel: patch_embed_forward.1
= control target key start
LH: loop header
LB: loop body
LE: loop exit
PB: predicated region body
PF: predicated region fallthrough
CT: control target
= control target key end

     0   :  { %8 = vsyncpa [#allocation3], 0  ;;  %s730_s0 = inlined_call_operand.vmem [shape: f32[32,128], index: 0, kind: input, shape index: {}]   ;;  %s731_s1 = inlined_call_operand.vmem [shape: f32[128,128], index: 1, kind: input, shape index: {}]   ;;  %s732_s2 = inlined_call_operand.vmem [shape: f32[1,128], index: 2, kind: input, shape index: {}]   ;;  %s733_s3 = inlined_call_operand.hbm [shape: f32[32,128], index: 3, kind: output, shape index: {}]  }
   0x1   :  { %10 = vsyncpa [#allocation3 + $0x1], 0  ;;  %s577_s12 = smov 0   ;;  %s579_s13 = smov 0  }
   0x2   :  { %s581_s14 = smov 0   ;;  %s583_s15 = smov 0  }
   0x3 LB: > { %s598_s16 = sadd.s32 4294967295, %s552_s15   ;;  %s350_s17 = sadd.s32 4294967294, %s552_s15   ;;  %s552_s15 = sphi %s583_s15, %s739_s15   ;;  %s548_s14 = sphi %s581_s14, %s738_s14   ;;  %s544_s13 = sphi %s579_s13, %s737_s13   ;;  %s540_s12 = sphi %s577_s12, %s736_s12  }
   0x4   : > { %s602_s18 = sadd.s32 1, %s552_s15   ;;  %s91_s19 = sadd.s32 1, %s548_s14 }
   0x5   : > { %s88_s20 = ssub.s32 %s552_s15, %s602_s18  ;;  %p101_p0 = scmp.ne.s32.totalorder %s548_s14, %s544_s13 }
   0x6   : > { %p89_p1 = scmp.eq.s32.totalorder %s88_s20, 0  ;;  %p102_p2 = scmp.eq.s32.totalorder %s598_s16, 1 }
   0x7   : > { %p107_p3 = scmp.ne.s32.totalorder %s544_s13, %s540_s12  ;;  %p108_p4 = scmp.eq.s32.totalorder %s350_s17, 1 }
   0x8   : > { %s613_s21 = scalar_select %p89_p1, %s548_s14, %s91_s19  }
   0x9   : > { %p615_p5 = por %p102_p2, %p101_p0  ;;  %p619_p6 = por %p108_p4, %p107_p3 }
   0xa   : > { %p353_p7 = scmp.ge.s32.totalorder %s552_s15, 1  ;;  %p141_p8 = scmp.lt.s32.totalorder %s552_s15, 3 }
   0xc   : > { %p142_p9 = pnand %p353_p7, %p141_p8 }
   0xd   : > { %v174_v0 = vld [vmem:[%s731_s1] sm:$0xff] (!%p142_p9)  ;;  %v175_v1 = vld [vmem:[%s731_s1 + $0x8] sm:$0xff] (!%p142_p9)  ;;  %v176_v2 = vld [vmem:[%s731_s1 + $0x10] sm:$0xff] (!%p142_p9)  ;;  %s355_s30 = sshll.u32 (!%p142_p9), %s598_s16, 1  ;;  %s162_s25 = sand.u32 (!%p142_p9), 1, %s544_s13  }
   0xe   : > { %145 = sbr.rel (%p142_p9) target bundleno = 278 (0x116), region = 32  ;;  %v417_v3 = vpack.c.bf16 (!%p142_p9), %v175_v1, %v174_v0  ;;  %v177_v4 = vld [vmem:[%s731_s1 + $0x18] sm:$0xff] (!%p142_p9)  ;;  %p166_p10 = scmp.lt.s32.totalorder (!%p142_p9), %s355_s30, 3  ;;  %v178_v6 = vld [vmem:[%s731_s1 + $0x20] sm:$0xff] (!%p142_p9)  ;;  %v179_v7 = vld [vmem:[%s731_s1 + $0x28] sm:$0xff] (!%p142_p9) }
   0xf   : > { %v421_v5 = vpack.c.bf16 (!%p142_p9), %v177_v4, %v176_v2  ;;  %v425_v8 = vpack.c.bf16 (!%p142_p9), %v179_v7, %v178_v6  ;;  %v180_v9 = vld [vmem:[%s731_s1 + $0x30] sm:$0xff] (!%p142_p9)  ;;  %v181_v10 = vld [vmem:[%s731_s1 + $0x38] sm:$0xff] (!%p142_p9)  ;;  %v182_v13 = vld [vmem:[%s731_s1 + $0x40] sm:$0xff] (!%p142_p9)  ;;  %s354_s27 = sshll.u32 (!%p142_p9), %s162_s25, 4  ;;  %s363_s5 = sshll.u32 (!%p142_p9), %s598_s16, 8 }
  0x10   : > { %418 = vmatprep.subr.bf16.mxu0 (!%p142_p9), %v417_v3  ;;  %v429_v12 = vpack.c.bf16 (!%p142_p9), %v181_v10, %v180_v9  ;;  %v183_v14 = vld [vmem:[%s731_s1 + $0x48] sm:$0xff] (!%p142_p9)  ;;  %v184_v16 = vld [vmem:[%s731_s1 + $0x50] sm:$0xff] (!%p142_p9)  ;;  %v185_v17 = vld [vmem:[%s731_s1 + $0x58] sm:$0xff] (!%p142_p9)  ;;  %s687_s7 = scalar_lea.hbm (!%p142_p9), %s733_s3, %s363_s5  ;;  %s689_s8 = scalar_lea.sflag (!%p142_p9), [#allocation3], %s162_s25 }
  0x11   : > { %420 = vmatpush3.bf16.msra.mxu0 (!%p142_p9), %v417_v3  ;;  %v433_v15 = vpack.c.bf16 (!%p142_p9), %v183_v14, %v182_v13  ;;  %v437_v18 = vpack.c.bf16 (!%p142_p9), %v185_v17, %v184_v16  ;;  %v186_v19 = vld [vmem:[%s731_s1 + $0x60] sm:$0xff] (!%p142_p9)  ;;  %v187_v20 = vld [vmem:[%s731_s1 + $0x68] sm:$0xff] (!%p142_p9)  ;;  %v188_v22 = vld [vmem:[%s731_s1 + $0x70] sm:$0xff] (!%p142_p9)  ;;  %s554_s16 = smov (!%p142_p9), [#allocation2]  }
  0x12   : > { %422 = vmatprep.subr.bf16.mxu0 (!%p142_p9), %v421_v5  ;;  %v441_v21 = vpack.c.bf16 (!%p142_p9), %v187_v20, %v186_v19  ;;  %v189_v23 = vld [vmem:[%s731_s1 + $0x78] sm:$0xff] (!%p142_p9)  ;;  %v357_v26 = vld [vmem:[%s732_s2] ss:$0 sm:$0xff] (!%p142_p9) }
  0x13   : > { %v445_v24 = vpack.c.bf16 (!%p142_p9), %v189_v23, %v188_v22 }
  0x15   : > { %s741_s30 = smov (!%p166_p10, %s355_s30), 3  ;;  %424 = vmatpush3.bf16.msra.mxu0 %v421_v5 }
  0x16   : > { %s356_s10 = sshll.u32 %s741_s30, 3  ;;  %426 = vmatprep.subr.bf16.mxu0 %v425_v8  ;;  %s164_s30 = scalar_lea.vmem [#allocation2], %s354_s27 }
  0x17   : > { %s169_s26 = scalar_lea.vmem %s730_s0, %s356_s10  ;;  %s288_s4 = sshll.u32 %s164_s30, 4  ;;  %s682_s4 = int_to_ptr.vmem [resolvable:$true] %s288_s4 }
  0x18   : > { %v172_v11 = vld [vmem:[%s169_s26] sm:$0xff]  ;;  %v173_v25 = vld [vmem:[%s169_s26 + $0x8] sm:$0xff]  ;;  %s490_s9 = scalar_lea.vmem %s682_s4, 256  ;;  %s494_s10 = sshll.u32 %s554_s16, 4  ;;  %s495_s10 = int_to_ptr.vmem [resolvable:$false] %s494_s10 }
  0x19   : > { %414 = vmatprep.mubr.f32.mxu0 %v172_v11  ;;  %428 = vmatpush3.bf16.msra.mxu0 %v425_v8  ;;  %p491_p11 = scmp.ne.s32.totalorder %s682_s4, %s490_s9  ;;  %s496_s11 = scalar_lea.vmem %s495_s10, 512 }
  0x1a   : > { %430 = vmatprep.subr.bf16.mxu0 %v429_v12  ;;  %p497_p0 = scmp.lt.s32.totalorder %s682_s4, %s495_s10  ;;  %p498_p1 = scmp.lt.s32.totalorder %s496_s11, %s490_s9 }
  0x1b   : > { %p492_p12 = pnand %p491_p11, %p615_p5 }
  0x1c   : > { %p499_p2 = por %p498_p1, %p497_p0 }
  0x1d   : > { %432 = vmatpush3.bf16.msra.mxu0 %v429_v12  ;;  %p493_p13 = pneg %p492_p12 }
  0x1e   : > { %434 = vmatprep.subr.bf16.mxu0 %v433_v15 }
  0x1f   : > { %p500_p3 = pnand %p499_p2, %p493_p13 }
  0x21   : > { %436 = vmatpush3.bf16.msra.mxu0 %v433_v15 }
  0x22   : > { %438 = vmatprep.subr.bf16.mxu0 %v437_v18 }
  0x25   : > { %440 = vmatpush3.bf16.msra.mxu0 %v437_v18 }
  0x26   : > { %442 = vmatprep.subr.bf16.mxu0 %v441_v21 }
  0x29   : > { %444 = vmatpush3.bf16.msra.mxu0 %v441_v21 }
  0x2a   : > { %446 = vmatprep.subr.bf16.mxu0 %v445_v24 }
  0x2d   : > { %448 = vmatpush3.bf16.msra.mxu0 %v445_v24 }
  0x30   : > { %415 = vmatmul.mubr.f32.vlgmr.msra.gmra.mrb[0].mxu0 %v173_v25 }
 0x103   : > { %v416_v27 = vpop.f32.mrb[0].mxu0 }
 0x104   : > { %v269_v28 = vadd.f32 %v416_v27, %v357_v26  ;;  %v263_v29 = vpop.f32.mrb[1].mxu0 }
 0x105   : > { %v264_v30 = vadd.f32 %v357_v26, %v263_v29 }
 0x106   : > { %273 = vst [vmem:[%s164_s30 + $0x8] sm:$0xff] %v269_v28 }
 0x107   : > { %272 = vst [vmem:[%s164_s30] sm:$0xff] %v264_v30 }
 0x108   : > { %503 = shalt.err (!%p500_p3)
}
 0x109   : > { %s504_s17 = scalar_lea.hbm %s687_s7, 256  ;;  %s508_s24 = scalar_lea.hbm %s733_s3, 512 }
 0x10a   : > { %p505_p4 = scmp.ne.s32.totalorder %s687_s7, %s504_s17  ;;  %p509_p9 = scmp.lt.u32.totalorder %s687_s7, %s733_s3 }
 0x10b   : > { %p510_p10 = scmp.lt.u32.totalorder %s508_s24, %s504_s17  ;;  %p512_p12 = scmp.lt.u32.totalorder %s504_s17, %s687_s7 }
 0x10c   : > { %p506_p7 = pnand %p505_p4, %p615_p5 }
 0x10d   : > { %p511_p11 = por %p510_p10, %p509_p9 }
 0x10e   : > { %p507_p8 = pneg %p506_p7 }
 0x10f   : > { %p513_p13 = por %p512_p12, %p511_p11 }
 0x111   : > { %p514_p0 = pnand %p513_p13, %p507_p8 }
 0x113   : > { %517 = shalt.err (!%p514_p0)
}
 0x114   : > { %s555_s28 = smov 128   ;;  %s556_s29 = smov 8  }
 0x115   : > { %449 = dma.vmem_to_hbm [thread:$0]  (%p615_p5), %s682_s4, 256, %s687_s7, %s689_s8, %s555_s28, %s555_s28, %s556_s29  }
 0x116 PF: > { %p455_p1 = scmp.ge.s32.totalorder %s552_s15, 2  ;;  %s303_s30 = sand.u32 1, %s540_s12  }
 0x117   : > { %s304_s5 = scalar_lea.sflag [#allocation3], %s303_s30 }
 0x118   : > { %p452_p2 = pnand %p455_p1, %p619_p6 }
 0x11a   : > { %535 = dma.done.wait (!%p452_p2), %s304_s5, 256  }
 0x11b   : > { %537 = vsyncadd (!%p452_p2), %s304_s5, 4294967040  ;;  %p13_p3 = scmp.ge.s32.totalorder %s602_s18, 4   ;;  %s736_s12 = smov %s544_s13 }
 0x11c   : > { %s737_s13 = smov %s548_s14  ;;  %s738_s14 = smov %s613_s21 }
 0x11d   : > { %s739_s15 = smov %s602_s18  ;;  %15 = sbr.rel (!%p13_p3) target bundleno = 3 (0x3), region = 67 }
 0x124   :  { %309 = vsyncpa [#allocation3], 1 }
 0x125   :  { %311 = vsyncpa [#allocation3 + $0x1], 1 }

</bundles_post_ra>
